<compile_context>
chip_gen: v7x
topology: tpu7x:2x2x1
jax: 0.10.0
libtpu: 0.0.40
codegen_flags: <defaults>
</compile_context>

<pallas_src>
import functools

import jax
import jax.numpy as jnp
from jax import lax
from jax.experimental import pallas as pl
from jax.experimental.pallas import tpu as pltpu  # noqa: F401  (TPU backend)


# ----------------------------------------------------------------------------
# In-kernel helpers
# ----------------------------------------------------------------------------
def _onehot_gather(ids, table):
    """Row gather `table[ids]` expressed as a one-hot x table MXU matmul.

    ids: (N, 1) int32, table: (V, H) f32  ->  (N, H) f32
    """
    n = ids.shape[0]
    v = table.shape[0]
    iota = lax.broadcasted_iota(jnp.int32, (n, v), 1)
    onehot = (iota == ids).astype(jnp.float32)
    return jnp.dot(onehot, table, preferred_element_type=jnp.float32)


def _conv_branch(ids, emb, w_ref, bias, batch, seq_len):
    """embed -> Conv1d(k=3, pad=1) -> ReLU -> global max-pool, whole batch at once.

    ids: (B*L, 1) int32, emb: (V, H), w_ref: (3, H, H) ref (tap, in, out),
    bias: (1, H).  Returns (B, H).
    """
    n = batch * seq_len
    h = emb.shape[1]
    x = _onehot_gather(ids, emb)                              # (B*L, H)

    # shift-by-one along the batched sequence axis; batch-boundary rows are
    # masked to zero, reproducing Conv1d padding=1 semantics without jnp.pad.
    zrow = jnp.zeros((1, h), jnp.float32)
    x_prev = jnp.concatenate([zrow, x[:n - 1, :]], axis=0)    # x[t-1]
    x_next = jnp.concatenate([x[1:, :], zrow], axis=0)        # x[t+1]
    row = lax.broadcasted_iota(jnp.int32, (n, 1), 0)
    is_first = functools.reduce(
        jnp.logical_or, [row == b * seq_len for b in range(batch)])
    is_last = functools.reduce(
        jnp.logical_or, [row == b * seq_len + seq_len - 1 for b in range(batch)])
    x_prev = jnp.where(is_first, 0.0, x_prev)
    x_next = jnp.where(is_last, 0.0, x_next)

    y = jnp.dot(x_prev, w_ref[0], preferred_element_type=jnp.float32)
    y = y + jnp.dot(x, w_ref[1], preferred_element_type=jnp.float32)
    y = y + jnp.dot(x_next, w_ref[2], preferred_element_type=jnp.float32)
    y = jnp.maximum(y + bias, 0.0)                            # (B*L, H)

    # global max-pool over the sequence, per batch element (stays in VMEM).
    return jnp.concatenate(
        [jnp.max(y[b * seq_len:(b + 1) * seq_len, :], axis=0, keepdims=True)
         for b in range(batch)], axis=0)                      # (B, H)


# ----------------------------------------------------------------------------
# Single fused kernel: gathers + both conv branches + category linear + head
# ----------------------------------------------------------------------------
def _fused_kernel(t_ids_ref, f_ids_ref, c_ids_ref,
                  t_emb_ref, f_emb_ref, c_emb_ref,
                  t_w_ref, t_b_ref, f_w_ref, f_b_ref,
                  wcat_ref, bcat_ref, winter_ref, binter_ref,
                  wfin_ref, bfin_ref, o_ref, *, B, L1, L2, NCAT, H):
    title = _conv_branch(t_ids_ref[...], t_emb_ref[...], t_w_ref, t_b_ref[...], B, L1)
    full = _conv_branch(f_ids_ref[...], f_emb_ref[...], f_w_ref, f_b_ref[...], B, L2)

    # category branch: embed -> flatten -> linear.  c_ids is ordered
    # (slot n, batch b), so the flattened-view linear becomes a sum of per-slot
    # (B,H) @ (H,H) matmuls (no in-kernel activation reshape needed).
    c_x = _onehot_gather(c_ids_ref[...], c_emb_ref[...])      # (NCAT*B, H)
    cat = jnp.zeros((B, H), jnp.float32)
    for ni in range(NCAT):
        cat = cat + jnp.dot(c_x[ni * B:(ni + 1) * B, :],
                            wcat_ref[ni * H:(ni + 1) * H, :],
                            preferred_element_type=jnp.float32)
    cat = cat + bcat_ref[...]                                 # (B, H)

    # head: the concat is fused away by splitting inter_dense's weight rows.
    hmid = jnp.dot(title, winter_ref[0:H, :], preferred_element_type=jnp.float32)
    hmid = hmid + jnp.dot(full, winter_ref[H:2 * H, :], preferred_element_type=jnp.float32)
    hmid = hmid + jnp.dot(cat, winter_ref[2 * H:3 * H, :], preferred_element_type=jnp.float32)
    hmid = jnp.maximum(hmid + binter_ref[...], 0.0)           # (B, 2H)
    o_ref[...] = (jnp.dot(hmid, wfin_ref[...], preferred_element_type=jnp.float32)
                  + bfin_ref[...])                            # (B, 1)


def three_inputs_net(params, input1, input2, input3):
    B, L1 = input1.shape
    _, L2 = input2.shape
    _, NCAT = input3.shape
    H = params["title_emb"].shape[1]

    # Only wrapper glue: flatten the tiny int32 id arrays (no pads, no gathers,
    # no activation materialisation outside the kernel).
    t_ids = input1.astype(jnp.int32).reshape(B * L1, 1)
    f_ids = input2.astype(jnp.int32).reshape(B * L2, 1)
    c_ids = jnp.transpose(input3.astype(jnp.int32)).reshape(NCAT * B, 1)

    kernel = functools.partial(_fused_kernel, B=B, L1=L1, L2=L2, NCAT=NCAT, H=H)
    # Single launch; grid=() -> every operand is one full-array VMEM block.
    return pl.pallas_call(
        kernel,
        out_shape=jax.ShapeDtypeStruct((B, 1), jnp.float32),
    )(t_ids, f_ids, c_ids,
      params["title_emb"], params["full_emb"], params["category_emb"],
      params["title_conv_w"], params["title_conv_b"],
      params["full_conv_w"], params["full_conv_b"],
      params["category_out_w"], params["category_out_b"],
      params["inter_w"], params["inter_b"],
      params["final_w"], params["final_b"])


# ----------------------------------------------------------------------------
# Pure-JAX reference (independent math path, PyTorch-equivalent)
# ----------------------------------------------------------------------------
def reference(params, input1, input2, input3):
    P = lax.Precision.HIGHEST

    def branch(emb_table, ids, w_k, b):
        x = emb_table[ids]                                    # (B, L, H)
        x_ncw = jnp.transpose(x, (0, 2, 1))                   # NCW like torch
        w_oiw = jnp.transpose(w_k, (2, 1, 0))                 # (out, in, k) torch layout
        y = lax.conv_general_dilated(
            x_ncw, w_oiw, window_strides=(1,), padding=[(1, 1)],
            dimension_numbers=("NCW", "OIW", "NCW"), precision=P)
        y = y + b.reshape(-1)[None, :, None]
        y = jnp.maximum(y, 0.0)
        return jnp.max(y, axis=2)                             # (B, H)

    title = branch(params["title_emb"], input1, params["title_conv_w"], params["title_conv_b"])
    full = branch(params["full_emb"], input2, params["full_conv_w"], params["full_conv_b"])
    c = params["category_emb"][input3].reshape(input3.shape[0], -1)
    cat = jnp.dot(c, params["category_out_w"], precision=P) + params["category_out_b"]
    concat = jnp.concatenate([title, full, cat], axis=1)
    h = jnp.maximum(jnp.dot(concat, params["inter_w"], precision=P) + params["inter_b"], 0.0)
    return jnp.dot(h, params["final_w"], precision=P) + params["final_b"]


# ----------------------------------------------------------------------------
# Deterministic parameter init (shapes follow the PyTorch module's __init__;
# linear weights stored (in, out); conv weights stored (tap, in, out); biases 2-D)
# ----------------------------------------------------------------------------
def init_params(key, n_tokens, n_cat_features, hid_size):
    ks = jax.random.split(key, 10)

    def norm(k, shape, scale=0.1):
        return (scale * jax.random.normal(k, shape)).astype(jnp.float32)

    return dict(
        title_emb=norm(ks[0], (n_tokens, hid_size), 1.0),
        title_conv_w=norm(ks[1], (3, hid_size, hid_size)),
        title_conv_b=norm(ks[2], (1, hid_size)),
        full_emb=norm(ks[3], (n_tokens, hid_size), 1.0),
        full_conv_w=norm(ks[4], (3, hid_size, hid_size)),
        full_conv_b=norm(ks[5], (1, hid_size)),
        category_emb=norm(ks[6], (n_cat_features, hid_size), 1.0),
        category_out_w=norm(ks[7], (n_cat_features * hid_size, hid_size)),
        category_out_b=jnp.zeros((1, hid_size), jnp.float32),
        inter_w=norm(ks[8], (3 * hid_size, 2 * hid_size)),    # concat_features = 3*H
        inter_b=jnp.zeros((1, 2 * hid_size), jnp.float32),
        final_w=norm(ks[9], (2 * hid_size, 1)),
        final_b=jnp.zeros((1, 1), jnp.float32),
    )


if __name__ == "__main__":
    B, L1, L2 = 2, 8, 12
    n_tokens, n_cat, hid = 50, 4, 32

    key = jax.random.PRNGKey(0)
    kp, k1, k2, k3 = jax.random.split(key, 4)
    params = init_params(kp, n_tokens, n_cat, hid)

    input1 = jax.random.randint(k1, (B, L1), 0, n_tokens, dtype=jnp.int32)   # title tokens
    input2 = jax.random.randint(k2, (B, L2), 0, n_tokens, dtype=jnp.int32)   # full-text tokens
    input3 = jax.random.randint(k3, (B, n_cat), 0, n_cat, dtype=jnp.int32)   # category ids

    out = jax.jit(three_inputs_net)(params, input1, input2, input3)
    out = jax.block_until_ready(out)
    assert out.shape == (B, 1) and out.dtype == jnp.float32

    ref = jax.block_until_ready(reference(params, input1, input2, input3))
    assert jnp.allclose(out, ref, atol=1e-3, rtol=1e-3), (out, ref)

    print("KERNEL_OK")
</pallas_src>

<mosaic_0001>
module attributes {stable_mosaic.version = 11 : i64} {
  func.func @_fused_kernel(%arg0: memref<16x1xi32, #tpu.memory_space<vmem>>, %arg1: memref<24x1xi32, #tpu.memory_space<vmem>>, %arg2: memref<8x1xi32, #tpu.memory_space<vmem>>, %arg3: memref<50x32xf32, #tpu.memory_space<vmem>>, %arg4: memref<50x32xf32, #tpu.memory_space<vmem>>, %arg5: memref<4x32xf32, #tpu.memory_space<vmem>>, %arg6: memref<3x32x32xf32, #tpu.memory_space<vmem>>, %arg7: memref<1x32xf32, #tpu.memory_space<vmem>>, %arg8: memref<3x32x32xf32, #tpu.memory_space<vmem>>, %arg9: memref<1x32xf32, #tpu.memory_space<vmem>>, %arg10: memref<128x32xf32, #tpu.memory_space<vmem>>, %arg11: memref<1x32xf32, #tpu.memory_space<vmem>>, %arg12: memref<96x64xf32, #tpu.memory_space<vmem>>, %arg13: memref<1x64xf32, #tpu.memory_space<vmem>>, %arg14: memref<64x1xf32, #tpu.memory_space<vmem>>, %arg15: memref<1x1xf32, #tpu.memory_space<vmem>>, %arg16: memref<2x1xf32, #tpu.memory_space<vmem>>) attributes {dimension_semantics = [], scalar_prefetch = 0 : i64, scratch_operands = 0 : i64, tpu.core_type = #tpu.core_type<tc>} {
    %c0 = arith.constant 0 : index
    %c0_0 = arith.constant 0 : index
    %0 = vector.load %arg0[%c0, %c0_0] : memref<16x1xi32, #tpu.memory_space<vmem>>, vector<16x1xi32>
    %c0_1 = arith.constant 0 : index
    %c0_2 = arith.constant 0 : index
    %1 = vector.load %arg3[%c0_1, %c0_2] : memref<50x32xf32, #tpu.memory_space<vmem>>, vector<50x32xf32>
    %c0_3 = arith.constant 0 : index
    %c0_4 = arith.constant 0 : index
    %2 = vector.load %arg7[%c0_3, %c0_4] : memref<1x32xf32, #tpu.memory_space<vmem>>, vector<1x32xf32>
    %3 = tpu.iota {dimensions = array<i32: 1>} : vector<16x50xi32>
    %4 = vector.broadcast %0 : vector<16x1xi32> to vector<16x50xi32>
    %5 = arith.cmpi eq, %3, %4 : vector<16x50xi32>
    %6 = arith.extui %5 : vector<16x50xi1> to vector<16x50xi32>
    %7 = arith.sitofp %6 : vector<16x50xi32> to vector<16x50xf32>
    %cst = arith.constant dense<0.000000e+00> : vector<16x32xf32>
    %8 = tpu.matmul %7, %1, %cst {dimension_numbers = #tpu.dot_dimension_numbers<[1], [0], [0], [1], [0, 0, 1, 1], [], []>} : vector<16x50xf32>, vector<50x32xf32>, vector<16x32xf32> -> vector<16x32xf32>
    %cst_5 = arith.constant 0.000000e+00 : f32
    %9 = vector.broadcast %cst_5 : f32 to vector<1x32xf32>
    %10 = vector.extract_strided_slice %8 {offsets = [0, 0], sizes = [15, 32], strides = [1, 1]} : vector<16x32xf32> to vector<15x32xf32>
    %11 = tpu.concatenate %9, %10 in 0 : vector<1x32xf32>, vector<15x32xf32> -> vector<16x32xf32>
    %12 = vector.extract_strided_slice %8 {offsets = [1, 0], sizes = [15, 32], strides = [1, 1]} : vector<16x32xf32> to vector<15x32xf32>
    %13 = tpu.concatenate %12, %9 in 0 : vector<15x32xf32>, vector<1x32xf32> -> vector<16x32xf32>
    %14 = tpu.iota {dimensions = array<i32: 0>} : vector<16x1xi32>
    %c0_i32 = arith.constant 0 : i32
    %15 = vector.broadcast %c0_i32 : i32 to vector<16x1xi32>
    %16 = arith.cmpi eq, %14, %15 : vector<16x1xi32>
    %c8_i32 = arith.constant 8 : i32
    %17 = vector.broadcast %c8_i32 : i32 to vector<16x1xi32>
    %18 = arith.cmpi eq, %14, %17 : vector<16x1xi32>
    %19 = arith.ori %16, %18 : vector<16x1xi1>
    %c7_i32 = arith.constant 7 : i32
    %20 = vector.broadcast %c7_i32 : i32 to vector<16x1xi32>
    %21 = arith.cmpi eq, %14, %20 : vector<16x1xi32>
    %c15_i32 = arith.constant 15 : i32
    %22 = vector.broadcast %c15_i32 : i32 to vector<16x1xi32>
    %23 = arith.cmpi eq, %14, %22 : vector<16x1xi32>
    %24 = arith.ori %21, %23 : vector<16x1xi1>
    %cst_6 = arith.constant 0.000000e+00 : f32
    %25 = vector.shape_cast %19 : vector<16x1xi1> to vector<16x1xi1>
    %26 = vector.broadcast %25 : vector<16x1xi1> to vector<16x32xi1>
    %27 = vector.broadcast %cst_6 : f32 to vector<16x32xf32>
    %28 = arith.select %26, %27, %11 : vector<16x32xi1>, vector<16x32xf32>
    %cst_7 = arith.constant 0.000000e+00 : f32
    %29 = vector.shape_cast %24 : vector<16x1xi1> to vector<16x1xi1>
    %30 = vector.broadcast %29 : vector<16x1xi1> to vector<16x32xi1>
    %31 = vector.broadcast %cst_7 : f32 to vector<16x32xf32>
    %32 = arith.select %30, %31, %13 : vector<16x32xi1>, vector<16x32xf32>
    %c0_8 = arith.constant 0 : index
    %c0_9 = arith.constant 0 : index
    %c0_10 = arith.constant 0 : index
    %33 = vector.load %arg6[%c0_8, %c0_9, %c0_10] : memref<3x32x32xf32, #tpu.memory_space<vmem>>, vector<1x32x32xf32>
    %34 = vector.shape_cast %33 : vector<1x32x32xf32> to vector<32x32xf32>
    %cst_11 = arith.constant dense<0.000000e+00> : vector<16x32xf32>
    %35 = tpu.matmul %28, %34, %cst_11 {dimension_numbers = #tpu.dot_dimension_numbers<[1], [0], [0], [1], [0, 0, 1, 1], [], []>} : vector<16x32xf32>, vector<32x32xf32>, vector<16x32xf32> -> vector<16x32xf32>
    %c1 = arith.constant 1 : index
    %c0_12 = arith.constant 0 : index
    %c0_13 = arith.constant 0 : index
    %36 = vector.load %arg6[%c1, %c0_12, %c0_13] : memref<3x32x32xf32, #tpu.memory_space<vmem>>, vector<1x32x32xf32>
    %37 = vector.shape_cast %36 : vector<1x32x32xf32> to vector<32x32xf32>
    %cst_14 = arith.constant dense<0.000000e+00> : vector<16x32xf32>
    %38 = tpu.matmul %8, %37, %cst_14 {dimension_numbers = #tpu.dot_dimension_numbers<[1], [0], [0], [1], [0, 0, 1, 1], [], []>} : vector<16x32xf32>, vector<32x32xf32>, vector<16x32xf32> -> vector<16x32xf32>
    %39 = arith.addf %35, %38 : vector<16x32xf32>
    %c2 = arith.constant 2 : index
    %c0_15 = arith.constant 0 : index
    %c0_16 = arith.constant 0 : index
    %40 = vector.load %arg6[%c2, %c0_15, %c0_16] : memref<3x32x32xf32, #tpu.memory_space<vmem>>, vector<1x32x32xf32>
    %41 = vector.shape_cast %40 : vector<1x32x32xf32> to vector<32x32xf32>
    %cst_17 = arith.constant dense<0.000000e+00> : vector<16x32xf32>
    %42 = tpu.matmul %32, %41, %cst_17 {dimension_numbers = #tpu.dot_dimension_numbers<[1], [0], [0], [1], [0, 0, 1, 1], [], []>} : vector<16x32xf32>, vector<32x32xf32>, vector<16x32xf32> -> vector<16x32xf32>
    %43 = arith.addf %39, %42 : vector<16x32xf32>
    %44 = vector.broadcast %2 : vector<1x32xf32> to vector<16x32xf32>
    %45 = arith.addf %43, %44 : vector<16x32xf32>
    %cst_18 = arith.constant 0.000000e+00 : f32
    %46 = vector.broadcast %cst_18 : f32 to vector<16x32xf32>
    %47 = arith.maximumf %45, %46 : vector<16x32xf32>
    %48 = vector.extract_strided_slice %47 {offsets = [0, 0], sizes = [8, 32], strides = [1, 1]} : vector<16x32xf32> to vector<8x32xf32>
    %cst_19 = arith.constant dense<0xFF800000> : vector<32xf32>
    %49 = vector.multi_reduction <maximumf>, %48, %cst_19 [0] : vector<8x32xf32> to vector<32xf32>
    %50 = vector.shape_cast %49 : vector<32xf32> to vector<1x32xf32>
    %51 = vector.extract_strided_slice %47 {offsets = [8, 0], sizes = [8, 32], strides = [1, 1]} : vector<16x32xf32> to vector<8x32xf32>
    %cst_20 = arith.constant dense<0xFF800000> : vector<32xf32>
    %52 = vector.multi_reduction <maximumf>, %51, %cst_20 [0] : vector<8x32xf32> to vector<32xf32>
    %53 = vector.shape_cast %52 : vector<32xf32> to vector<1x32xf32>
    %54 = tpu.concatenate %50, %53 in 0 : vector<1x32xf32>, vector<1x32xf32> -> vector<2x32xf32>
    %c0_21 = arith.constant 0 : index
    %c0_22 = arith.constant 0 : index
    %55 = vector.load %arg1[%c0_21, %c0_22] : memref<24x1xi32, #tpu.memory_space<vmem>>, vector<24x1xi32>
    %c0_23 = arith.constant 0 : index
    %c0_24 = arith.constant 0 : index
    %56 = vector.load %arg4[%c0_23, %c0_24] : memref<50x32xf32, #tpu.memory_space<vmem>>, vector<50x32xf32>
    %c0_25 = arith.constant 0 : index
    %c0_26 = arith.constant 0 : index
    %57 = vector.load %arg9[%c0_25, %c0_26] : memref<1x32xf32, #tpu.memory_space<vmem>>, vector<1x32xf32>
    %58 = tpu.iota {dimensions = array<i32: 1>} : vector<24x50xi32>
    %59 = vector.broadcast %55 : vector<24x1xi32> to vector<24x50xi32>
    %60 = arith.cmpi eq, %58, %59 : vector<24x50xi32>
    %61 = arith.extui %60 : vector<24x50xi1> to vector<24x50xi32>
    %62 = arith.sitofp %61 : vector<24x50xi32> to vector<24x50xf32>
    %cst_27 = arith.constant dense<0.000000e+00> : vector<24x32xf32>
    %63 = tpu.matmul %62, %56, %cst_27 {dimension_numbers = #tpu.dot_dimension_numbers<[1], [0], [0], [1], [0, 0, 1, 1], [], []>} : vector<24x50xf32>, vector<50x32xf32>, vector<24x32xf32> -> vector<24x32xf32>
    %cst_28 = arith.constant 0.000000e+00 : f32
    %64 = vector.broadcast %cst_28 : f32 to vector<1x32xf32>
    %65 = vector.extract_strided_slice %63 {offsets = [0, 0], sizes = [23, 32], strides = [1, 1]} : vector<24x32xf32> to vector<23x32xf32>
    %66 = tpu.concatenate %64, %65 in 0 : vector<1x32xf32>, vector<23x32xf32> -> vector<24x32xf32>
    %67 = vector.extract_strided_slice %63 {offsets = [1, 0], sizes = [23, 32], strides = [1, 1]} : vector<24x32xf32> to vector<23x32xf32>
    %68 = tpu.concatenate %67, %64 in 0 : vector<23x32xf32>, vector<1x32xf32> -> vector<24x32xf32>
    %69 = tpu.iota {dimensions = array<i32: 0>} : vector<24x1xi32>
    %c0_i32_29 = arith.constant 0 : i32
    %70 = vector.broadcast %c0_i32_29 : i32 to vector<24x1xi32>
    %71 = arith.cmpi eq, %69, %70 : vector<24x1xi32>
    %c12_i32 = arith.constant 12 : i32
    %72 = vector.broadcast %c12_i32 : i32 to vector<24x1xi32>
    %73 = arith.cmpi eq, %69, %72 : vector<24x1xi32>
    %74 = arith.ori %71, %73 : vector<24x1xi1>
    %c11_i32 = arith.constant 11 : i32
    %75 = vector.broadcast %c11_i32 : i32 to vector<24x1xi32>
    %76 = arith.cmpi eq, %69, %75 : vector<24x1xi32>
    %c23_i32 = arith.constant 23 : i32
    %77 = vector.broadcast %c23_i32 : i32 to vector<24x1xi32>
    %78 = arith.cmpi eq, %69, %77 : vector<24x1xi32>
    %79 = arith.ori %76, %78 : vector<24x1xi1>
    %cst_30 = arith.constant 0.000000e+00 : f32
    %80 = vector.shape_cast %74 : vector<24x1xi1> to vector<24x1xi1>
    %81 = vector.broadcast %80 : vector<24x1xi1> to vector<24x32xi1>
    %82 = vector.broadcast %cst_30 : f32 to vector<24x32xf32>
    %83 = arith.select %81, %82, %66 : vector<24x32xi1>, vector<24x32xf32>
    %cst_31 = arith.constant 0.000000e+00 : f32
    %84 = vector.shape_cast %79 : vector<24x1xi1> to vector<24x1xi1>
    %85 = vector.broadcast %84 : vector<24x1xi1> to vector<24x32xi1>
    %86 = vector.broadcast %cst_31 : f32 to vector<24x32xf32>
    %87 = arith.select %85, %86, %68 : vector<24x32xi1>, vector<24x32xf32>
    %c0_32 = arith.constant 0 : index
    %c0_33 = arith.constant 0 : index
    %c0_34 = arith.constant 0 : index
    %88 = vector.load %arg8[%c0_32, %c0_33, %c0_34] : memref<3x32x32xf32, #tpu.memory_space<vmem>>, vector<1x32x32xf32>
    %89 = vector.shape_cast %88 : vector<1x32x32xf32> to vector<32x32xf32>
    %cst_35 = arith.constant dense<0.000000e+00> : vector<24x32xf32>
    %90 = tpu.matmul %83, %89, %cst_35 {dimension_numbers = #tpu.dot_dimension_numbers<[1], [0], [0], [1], [0, 0, 1, 1], [], []>} : vector<24x32xf32>, vector<32x32xf32>, vector<24x32xf32> -> vector<24x32xf32>
    %c1_36 = arith.constant 1 : index
    %c0_37 = arith.constant 0 : index
    %c0_38 = arith.constant 0 : index
    %91 = vector.load %arg8[%c1_36, %c0_37, %c0_38] : memref<3x32x32xf32, #tpu.memory_space<vmem>>, vector<1x32x32xf32>
    %92 = vector.shape_cast %91 : vector<1x32x32xf32> to vector<32x32xf32>
    %cst_39 = arith.constant dense<0.000000e+00> : vector<24x32xf32>
    %93 = tpu.matmul %63, %92, %cst_39 {dimension_numbers = #tpu.dot_dimension_numbers<[1], [0], [0], [1], [0, 0, 1, 1], [], []>} : vector<24x32xf32>, vector<32x32xf32>, vector<24x32xf32> -> vector<24x32xf32>
    %94 = arith.addf %90, %93 : vector<24x32xf32>
    %c2_40 = arith.constant 2 : index
    %c0_41 = arith.constant 0 : index
    %c0_42 = arith.constant 0 : index
    %95 = vector.load %arg8[%c2_40, %c0_41, %c0_42] : memref<3x32x32xf32, #tpu.memory_space<vmem>>, vector<1x32x32xf32>
    %96 = vector.shape_cast %95 : vector<1x32x32xf32> to vector<32x32xf32>
    %cst_43 = arith.constant dense<0.000000e+00> : vector<24x32xf32>
    %97 = tpu.matmul %87, %96, %cst_43 {dimension_numbers = #tpu.dot_dimension_numbers<[1], [0], [0], [1], [0, 0, 1, 1], [], []>} : vector<24x32xf32>, vector<32x32xf32>, vector<24x32xf32> -> vector<24x32xf32>
    %98 = arith.addf %94, %97 : vector<24x32xf32>
    %99 = vector.broadcast %57 : vector<1x32xf32> to vector<24x32xf32>
    %100 = arith.addf %98, %99 : vector<24x32xf32>
    %cst_44 = arith.constant 0.000000e+00 : f32
    %101 = vector.broadcast %cst_44 : f32 to vector<24x32xf32>
    %102 = arith.maximumf %100, %101 : vector<24x32xf32>
    %103 = vector.extract_strided_slice %102 {offsets = [0, 0], sizes = [12, 32], strides = [1, 1]} : vector<24x32xf32> to vector<12x32xf32>
    %cst_45 = arith.constant dense<0xFF800000> : vector<32xf32>
    %104 = vector.multi_reduction <maximumf>, %103, %cst_45 [0] : vector<12x32xf32> to vector<32xf32>
    %105 = vector.shape_cast %104 : vector<32xf32> to vector<1x32xf32>
    %106 = vector.extract_strided_slice %102 {offsets = [12, 0], sizes = [12, 32], strides = [1, 1]} : vector<24x32xf32> to vector<12x32xf32>
    %cst_46 = arith.constant dense<0xFF800000> : vector<32xf32>
    %107 = vector.multi_reduction <maximumf>, %106, %cst_46 [0] : vector<12x32xf32> to vector<32xf32>
    %108 = vector.shape_cast %107 : vector<32xf32> to vector<1x32xf32>
    %109 = tpu.concatenate %105, %108 in 0 : vector<1x32xf32>, vector<1x32xf32> -> vector<2x32xf32>
    %c0_47 = arith.constant 0 : index
    %c0_48 = arith.constant 0 : index
    %110 = vector.load %arg2[%c0_47, %c0_48] : memref<8x1xi32, #tpu.memory_space<vmem>>, vector<8x1xi32>
    %c0_49 = arith.constant 0 : index
    %c0_50 = arith.constant 0 : index
    %111 = vector.load %arg5[%c0_49, %c0_50] : memref<4x32xf32, #tpu.memory_space<vmem>>, vector<4x32xf32>
    %112 = tpu.iota {dimensions = array<i32: 1>} : vector<8x4xi32>
    %113 = vector.broadcast %110 : vector<8x1xi32> to vector<8x4xi32>
    %114 = arith.cmpi eq, %112, %113 : vector<8x4xi32>
    %115 = arith.extui %114 : vector<8x4xi1> to vector<8x4xi32>
    %116 = arith.sitofp %115 : vector<8x4xi32> to vector<8x4xf32>
    %cst_51 = arith.constant dense<0.000000e+00> : vector<8x32xf32>
    %117 = tpu.matmul %116, %111, %cst_51 {dimension_numbers = #tpu.dot_dimension_numbers<[1], [0], [0], [1], [0, 0, 1, 1], [], []>} : vector<8x4xf32>, vector<4x32xf32>, vector<8x32xf32> -> vector<8x32xf32>
    %cst_52 = arith.constant 0.000000e+00 : f32
    %118 = vector.broadcast %cst_52 : f32 to vector<2x32xf32>
    %119 = vector.extract_strided_slice %117 {offsets = [0, 0], sizes = [2, 32], strides = [1, 1]} : vector<8x32xf32> to vector<2x32xf32>
    %c0_53 = arith.constant 0 : index
    %c0_54 = arith.constant 0 : index
    %120 = vector.load %arg10[%c0_53, %c0_54] : memref<128x32xf32, #tpu.memory_space<vmem>>, vector<32x32xf32>
    %cst_55 = arith.constant dense<0.000000e+00> : vector<2x32xf32>
    %121 = tpu.matmul %119, %120, %cst_55 {dimension_numbers = #tpu.dot_dimension_numbers<[1], [0], [0], [1], [0, 0, 1, 1], [], []>} : vector<2x32xf32>, vector<32x32xf32>, vector<2x32xf32> -> vector<2x32xf32>
    %122 = arith.addf %118, %121 : vector<2x32xf32>
    %123 = vector.extract_strided_slice %117 {offsets = [2, 0], sizes = [2, 32], strides = [1, 1]} : vector<8x32xf32> to vector<2x32xf32>
    %c32 = arith.constant 32 : index
    %c0_56 = arith.constant 0 : index
    %124 = vector.load %arg10[%c32, %c0_56] : memref<128x32xf32, #tpu.memory_space<vmem>>, vector<32x32xf32>
    %cst_57 = arith.constant dense<0.000000e+00> : vector<2x32xf32>
    %125 = tpu.matmul %123, %124, %cst_57 {dimension_numbers = #tpu.dot_dimension_numbers<[1], [0], [0], [1], [0, 0, 1, 1], [], []>} : vector<2x32xf32>, vector<32x32xf32>, vector<2x32xf32> -> vector<2x32xf32>
    %126 = arith.addf %122, %125 : vector<2x32xf32>
    %127 = vector.extract_strided_slice %117 {offsets = [4, 0], sizes = [2, 32], strides = [1, 1]} : vector<8x32xf32> to vector<2x32xf32>
    %c64 = arith.constant 64 : index
    %c0_58 = arith.constant 0 : index
    %128 = vector.load %arg10[%c64, %c0_58] : memref<128x32xf32, #tpu.memory_space<vmem>>, vector<32x32xf32>
    %cst_59 = arith.constant dense<0.000000e+00> : vector<2x32xf32>
    %129 = tpu.matmul %127, %128, %cst_59 {dimension_numbers = #tpu.dot_dimension_numbers<[1], [0], [0], [1], [0, 0, 1, 1], [], []>} : vector<2x32xf32>, vector<32x32xf32>, vector<2x32xf32> -> vector<2x32xf32>
    %130 = arith.addf %126, %129 : vector<2x32xf32>
    %131 = vector.extract_strided_slice %117 {offsets = [6, 0], sizes = [2, 32], strides = [1, 1]} : vector<8x32xf32> to vector<2x32xf32>
    %c96 = arith.constant 96 : index
    %c0_60 = arith.constant 0 : index
    %132 = vector.load %arg10[%c96, %c0_60] : memref<128x32xf32, #tpu.memory_space<vmem>>, vector<32x32xf32>
    %cst_61 = arith.constant dense<0.000000e+00> : vector<2x32xf32>
    %133 = tpu.matmul %131, %132, %cst_61 {dimension_numbers = #tpu.dot_dimension_numbers<[1], [0], [0], [1], [0, 0, 1, 1], [], []>} : vector<2x32xf32>, vector<32x32xf32>, vector<2x32xf32> -> vector<2x32xf32>
    %134 = arith.addf %130, %133 : vector<2x32xf32>
    %c0_62 = arith.constant 0 : index
    %c0_63 = arith.constant 0 : index
    %135 = vector.load %arg11[%c0_62, %c0_63] : memref<1x32xf32, #tpu.memory_space<vmem>>, vector<1x32xf32>
    %136 = vector.broadcast %135 : vector<1x32xf32> to vector<2x32xf32>
    %137 = arith.addf %134, %136 : vector<2x32xf32>
    %c0_64 = arith.constant 0 : index
    %c0_65 = arith.constant 0 : index
    %138 = vector.load %arg12[%c0_64, %c0_65] : memref<96x64xf32, #tpu.memory_space<vmem>>, vector<32x64xf32>
    %cst_66 = arith.constant dense<0.000000e+00> : vector<2x64xf32>
    %139 = tpu.matmul %54, %138, %cst_66 {dimension_numbers = #tpu.dot_dimension_numbers<[1], [0], [0], [1], [0, 0, 1, 1], [], []>} : vector<2x32xf32>, vector<32x64xf32>, vector<2x64xf32> -> vector<2x64xf32>
    %c32_67 = arith.constant 32 : index
    %c0_68 = arith.constant 0 : index
    %140 = vector.load %arg12[%c32_67, %c0_68] : memref<96x64xf32, #tpu.memory_space<vmem>>, vector<32x64xf32>
    %cst_69 = arith.constant dense<0.000000e+00> : vector<2x64xf32>
    %141 = tpu.matmul %109, %140, %cst_69 {dimension_numbers = #tpu.dot_dimension_numbers<[1], [0], [0], [1], [0, 0, 1, 1], [], []>} : vector<2x32xf32>, vector<32x64xf32>, vector<2x64xf32> -> vector<2x64xf32>
    %142 = arith.addf %139, %141 : vector<2x64xf32>
    %c64_70 = arith.constant 64 : index
    %c0_71 = arith.constant 0 : index
    %143 = vector.load %arg12[%c64_70, %c0_71] : memref<96x64xf32, #tpu.memory_space<vmem>>, vector<32x64xf32>
    %cst_72 = arith.constant dense<0.000000e+00> : vector<2x64xf32>
    %144 = tpu.matmul %137, %143, %cst_72 {dimension_numbers = #tpu.dot_dimension_numbers<[1], [0], [0], [1], [0, 0, 1, 1], [], []>} : vector<2x32xf32>, vector<32x64xf32>, vector<2x64xf32> -> vector<2x64xf32>
    %145 = arith.addf %142, %144 : vector<2x64xf32>
    %c0_73 = arith.constant 0 : index
    %c0_74 = arith.constant 0 : index
    %146 = vector.load %arg13[%c0_73, %c0_74] : memref<1x64xf32, #tpu.memory_space<vmem>>, vector<1x64xf32>
    %147 = vector.broadcast %146 : vector<1x64xf32> to vector<2x64xf32>
    %148 = arith.addf %145, %147 : vector<2x64xf32>
    %cst_75 = arith.constant 0.000000e+00 : f32
    %149 = vector.broadcast %cst_75 : f32 to vector<2x64xf32>
    %150 = arith.maximumf %148, %149 : vector<2x64xf32>
    %c0_76 = arith.constant 0 : index
    %c0_77 = arith.constant 0 : index
    %151 = vector.load %arg14[%c0_76, %c0_77] : memref<64x1xf32, #tpu.memory_space<vmem>>, vector<64x1xf32>
    %cst_78 = arith.constant dense<0.000000e+00> : vector<2x1xf32>
    %152 = tpu.matmul %150, %151, %cst_78 {dimension_numbers = #tpu.dot_dimension_numbers<[1], [0], [0], [1], [0, 0, 1, 1], [], []>} : vector<2x64xf32>, vector<64x1xf32>, vector<2x1xf32> -> vector<2x1xf32>
    %c0_79 = arith.constant 0 : index
    %c0_80 = arith.constant 0 : index
    %153 = vector.load %arg15[%c0_79, %c0_80] : memref<1x1xf32, #tpu.memory_space<vmem>>, vector<1x1xf32>
    %154 = vector.broadcast %153 : vector<1x1xf32> to vector<2x1xf32>
    %155 = arith.addf %152, %154 : vector<2x1xf32>
    %c0_81 = arith.constant 0 : index
    %c0_82 = arith.constant 0 : index
    %156 = vector.load %arg16[%c0_81, %c0_82] : memref<2x1xf32, #tpu.memory_space<vmem>>, vector<2x1xf32>
    tpu.vector_store %arg16[%c0_81, %c0_82], %155 {strides = array<i32>} : memref<2x1xf32, #tpu.memory_space<vmem>>, vector<2x1xf32>,
    return
  }
}

</mosaic_0001>

<bundles_post_ra>
// kernel: three_inputs_net.1
= control target key start
LH: loop header
LB: loop body
LE: loop exit
PB: predicated region body
PF: predicated region fallthrough
CT: control target
= control target key end

     0   :  { %v2241_v0 = vmov 0   ;;  %vm86_vm0 = vcmask 1041408   ;;  %v2242_v17 = vmov 0.0|0.0   ;;  %v65_v24 = vlaneseq  ;;  %s2752_s0 = inlined_call_operand.vmem [shape: s32[16,1], index: 0, kind: input, shape index: {}]   ;;  %s2753_s1 = inlined_call_operand.vmem [shape: s32[24,1], index: 1, kind: input, shape index: {}]   ;;  %s2754_s3 = inlined_call_operand.vmem [shape: f32[50,32], index: 3, kind: input, shape index: {}]   ;;  %s2755_s2 = inlined_call_operand.vmem [shape: s32[8,1], index: 2, kind: input, shape index: {}]   ;;  %s2756_s6 = inlined_call_operand.vmem [shape: f32[3,32,32], index: 6, kind: input, shape index: {}]   ;;  %s2757_s4 = inlined_call_operand.vmem [shape: f32[50,32], index: 4, kind: input, shape index: {}]   ;;  %s2758_s8 = inlined_call_operand.vmem [shape: f32[3,32,32], index: 8, kind: input, shape index: {}]   ;;  %s2759_s5 = inlined_call_operand.vmem [shape: f32[4,32], index: 5, kind: input, shape index: {}]   ;;  %s2760_s10 = inlined_call_operand.vmem [shape: f32[128,32], index: 10, kind: input, shape index: {}]   ;;  %s2761_s7 = inlined_call_operand.vmem [shape: f32[1,32], index: 7, kind: input, shape index: {}]   ;;  %s2762_s12 = inlined_call_operand.vmem [shape: f32[96,64], index: 12, kind: input, shape index: {}]   ;;  %s2763_s9 = inlined_call_operand.vmem [shape: f32[1,32], index: 9, kind: input, shape index: {}]   ;;  %s2764_s14 = inlined_call_operand.vmem [shape: f32[64,1], index: 14, kind: input, shape index: {}]   ;;  %s2765_s11 = inlined_call_operand.vmem [shape: f32[1,32], index: 11, kind: input, shape index: {}]   ;;  %s2766_s15 = inlined_call_operand.<no memory space> [shape: f32[1,1], index: 15, kind: input, shape index: {}]   ;;  %s2767_s13 = inlined_call_operand.vmem [shape: f32[1,64], index: 13, kind: input, shape index: {}]   ;;  %s2768_s16 = inlined_call_operand.vmem [shape: f32[2,1], index: 16, kind: output, shape index: {}]  }
   0x1   :  { %2770 = sst [smem:[#allocation3_spill]] %s2752_s0  ;;  %2239 = vset.pattern.permute.xlu0 %v2241_v0  ;;  %2240 = vset.pattern.permute.xlu1 %v2241_v0  ;;  %v491_v3 = vld [vmem:[%s2753_s1] sm:$0xff]  ;;  %v58_v5 = vld [vmem:[%s2754_s3 + $0x8] sm:$0xff]  ;;  %v59_v6 = vld [vmem:[%s2754_s3 + $0x10] sm:$0xff]  ;;  %vm79_vm1 = vcmask 408576   ;;  %v2243_v29 = vmov 0.0  }
   0x2   :  { %s2771_s23 = sld [smem:[#allocation3_spill]]  ;;  %503 = vperm.xlu1 %2240, %v491_v3   ;;  %v57_v4 = vld [vmem:[%s2754_s3] sm:$0xff]  ;;  %v492_v7 = vld [vmem:[%s2753_s1 + $0x8] sm:$0xff]  ;;  %v60_v9 = vld [vmem:[%s2754_s3 + $0x18] sm:$0xff]  ;;  %v2385_v25 = vand.u32 127, %v65_v24  ;;  %vm2244_vm4 = vmmov 0  }
   0x3   :  { %v2110_v8 = vpack.c.bf16 %v58_v5, %v57_v4  ;;  %v2114_v10 = vpack.c.bf16 %v60_v9, %v59_v6  ;;  %v61_v11 = vld [vmem:[%s2754_s3 + $0x20] sm:$0xff]  ;;  %v62_v12 = vld [vmem:[%s2754_s3 + $0x28] sm:$0xff]  ;;  %v493_v13 = vld [vmem:[%s2753_s1 + $0x10] sm:$0xff]  ;;  %vm217_vm8 = vcmask 261120   ;;  %v2469_v58 = vshrl.u32 %v65_v24, 7 }
   0x4   :  { %v982_v14 = vld [vmem:[%s2755_s2] sm:$0xff]  ;;  %v2118_v15 = vpack.c.bf16 %v62_v12, %v61_v11  ;;  %v63_v16 = vld [vmem:[%s2754_s3 + $0x30] sm:$0x3]  ;;  %v1728_v19 = vld [vmem:[%s2756_s6 + $0x28] sm:$0xff]  ;;  %vm174_vm9 = vcmask 1046528   ;;  %vm167_vm10 = vcmask 1040384  }
   0x5   :  { %2111 = vmatprep.subr.bf16.mxu0 %v2110_v8  ;;  %v1727_v18 = vld [vmem:[%s2756_s6 + $0x20] sm:$0xff]  ;;  %v1729_v20 = vld [vmem:[%s2756_s6 + $0x30] sm:$0xff]  ;;  %v1730_v22 = vld [vmem:[%s2756_s6 + $0x38] sm:$0xff]  ;;  %vm184_vm11 = vcmp.eq.s32.totalorder %v2469_v58, 0  ;;  %v2481_v4 = vadd.s32 8, %v2469_v58  ;;  %vm190_vm13 = vcmp.eq.s32.totalorder %v2469_v58, 7 }
   0x6   :  { %506 = vperm.xlu1 %2240, %v492_v7   ;;  %2113 = vmatpush3.bf16.msra.mxu0 %v2110_v8  ;;  %v2122_v21 = vpack.c.bf16 %v1728_v19, %v1727_v18  ;;  %v2126_v23 = vpack.c.bf16 %v1730_v22, %v1729_v20  ;;  %v494_v27 = vld [vmem:[%s2757_s4] sm:$0xff]  ;;  %v495_v28 = vld [vmem:[%s2757_s4 + $0x8] sm:$0xff]  ;;  %v496_v33 = vld [vmem:[%s2757_s4 + $0x10] sm:$0xff]  ;;  %vm994_vm15 = vcmask 1043456  }
   0x7   :  { %2115 = vmatprep.subr.bf16.mxu0 %v2114_v10  ;;  %v2147_v32 = vpack.c.bf16 %v495_v28, %v494_v27  ;;  %v497_v34 = vld [vmem:[%s2757_s4 + $0x18] sm:$0xff]  ;;  %v498_v37 = vld [vmem:[%s2757_s4 + $0x20] sm:$0xff]  ;;  %v499_v38 = vld [vmem:[%s2757_s4 + $0x28] sm:$0xff]  ;;  %vm187_vm12 = vcmp.eq.s32.totalorder %v2481_v4, 8  ;;  %vm193_vm14 = vcmp.eq.s32.totalorder %v2481_v4, 15 }
   0x8   :  { %v55_v1 = vld [vmem:[%s2771_s23] sm:$0xff]  ;;  %v56_v2 = vld [vmem:[%s2771_s23 + $0x8] sm:$0xff]  ;;  %2123 = vmatprep.subr.bf16.mxu1 %v2122_v21  ;;  %v2150_v36 = vpack.c.bf16 %v497_v34, %v496_v33  ;;  %v2153_v39 = vpack.c.bf16 %v499_v38, %v498_v37  ;;  %v500_v41 = vld [vmem:[%s2757_s4 + $0x30] sm:$0x3] }
   0x9   :  { %68 = vperm.xlu0 %2239, %v55_v1   ;;  %2125 = vmatpush3.bf16.msra.mxu1 %v2122_v21  ;;  %v208_v47 = vld [vmem:[%s2756_s6] sm:$0xff]  ;;  %v209_v48 = vld [vmem:[%s2756_s6 + $0x8] sm:$0xff]  ;;  %v670_v53 = vld [vmem:[%s2758_s8 + $0x10] sm:$0xff] }
   0xa   :  { %985 = vperm.xlu1 %2240, %v982_v14   ;;  %2117 = vmatpush3.bf16.msra.mxu0 %v2114_v10  ;;  %v2130_v49 = vpack.c.bf16 %v209_v48, %v208_v47  ;;  %v668_v50 = vld [vmem:[%s2758_s8] sm:$0xff]  ;;  %v669_v51 = vld [vmem:[%s2758_s8 + $0x8] sm:$0xff]  ;;  %v671_v54 = vld [vmem:[%s2758_s8 + $0x18] sm:$0xff] }
   0xb   :  { %2119 = vmatprep.subr.bf16.mxu0 %v2118_v15  ;;  %2127 = vmatprep.subr.bf16.mxu1 %v2126_v23  ;;  %v2448_v52 = vpack.c.bf16 %v669_v51, %v668_v50  ;;  %v2458_v55 = vpack.c.bf16 %v671_v54, %v670_v53  ;;  %v210_v56 = vld [vmem:[%s2756_s6 + $0x10] sm:$0xff]  ;;  %v211_v57 = vld [vmem:[%s2756_s6 + $0x18] sm:$0xff]  ;;  %v1736_v3 = vld [vmem:[%s2756_s6 + $0x48] sm:$0xff] }
   0xc   :  { %v2134_v63 = vpack.c.bf16 %v211_v57, %v210_v56  ;;  %v1737_v10 = vld [vmem:[%s2756_s6 + $0x50] sm:$0xff]  ;;  %v1738_v11 = vld [vmem:[%s2756_s6 + $0x58] sm:$0xff]  ;;  %v1760_v50 = vld [vmem:[%s2758_s8 + $0x48] sm:$0xff] }
   0xd   :  { %71 = vperm.xlu0 %2239, %v56_v2   ;;  %2129 = vmatpush3.bf16.msra.mxu1 %v2126_v23  ;;  %v1735_v2 = vld [vmem:[%s2756_s6 + $0x40] sm:$0xff]  ;;  %v2142_v12 = vpack.c.bf16 %v1738_v11, %v1737_v10  ;;  %v1752_v28 = vld [vmem:[%s2758_s8 + $0x38] sm:$0xff]  ;;  %v1073_v57 = vld [vmem:[%s2760_s10 + $0x28] sm:$0xff] }
   0xe   :  { %2121 = vmatpush3.bf16.msra.mxu0 %v2118_v15  ;;  %2131 = vmatprep.subr.bf16.mxu1 %v2130_v49  ;;  %v2138_v9 = vpack.c.bf16 %v1736_v3, %v1735_v2  ;;  %v1749_v15 = vld [vmem:[%s2758_s8 + $0x20] sm:$0xff]  ;;  %v1762_v53 = vld [vmem:[%s2758_s8 + $0x58] sm:$0xff]  ;;  %v1074_v2 = vld [vmem:[%s2760_s10 + $0x30] sm:$0xff] }
   0xf   :  { %1897 = vmatprep.subr.msk.mxu0 %vm86_vm0, %v63_v16  ;;  %v983_v23 = vld [vmem:[%s2759_s5] sm:$0xf]  ;;  %v1075_v3 = vld [vmem:[%s2760_s10 + $0x38] sm:$0xff] }
  0x10   :  { %v1072_v56 = vld [vmem:[%s2760_s10 + $0x20] sm:$0xff] }
  0x11   :  { %509 = vperm.xlu0 %2239, %v493_v13  }
  0x12   :  { %1898 = vmatpush3.msk.msra.mxu0 %vm86_vm0, %v63_v16  ;;  %v1750_v16 = vld [vmem:[%s2758_s8 + $0x28] sm:$0xff] }
  0x13   :  { %2146 = vmatprep.subr.bf16.mxu0 %v2242_v17  ;;  %v2156_v24 = vpack.c.bf16 %v1750_v16, %v1749_v15 }
  0x81   :  { %v504_v40 = vpop.permute.xlu1 %503 }
  0x82   :  { %vm511_vm5 = vcmp.eq.s32.totalorder %v2385_v25, %v504_v40 }
  0x83   :  { %v1742_v42 = vsel %vm511_vm5, 1.0, %v2243_v29 }
  0x85   :  { %v507_v43 = vpop.permute.xlu1 %506 }
  0x86   :  { %vm512_vm6 = vcmp.eq.s32.totalorder %v2385_v25, %v507_v43 }
  0x87   :  { %v1743_v45 = vsel %vm512_vm6, 1.0, %v2243_v29  ;;  %vm962_vm6 = vcmask 257024  }
  0x88   :  { %v69_v26 = vpop.permute.xlu0 %68 }
  0x89   :  { %vm73_vm2 = vcmp.eq.s32.totalorder %v2385_v25, %v69_v26  ;;  %v986_v22 = vpop.permute.xlu1 %985  ;;  %v1751_v26 = vld [vmem:[%s2758_s8 + $0x30] sm:$0xff] }
  0x8a   :  { %v1722_v30 = vsel %vm73_vm2, 1.0, %v2243_v29  ;;  %vm636_vm2 = vcmp.eq.s32.totalorder %v2481_v4, 12 }
  0x8b   :  { %1899 = vmatprep.mubr.msk.f32.mxu0 %vm79_vm1, %v1722_v30  ;;  %v1068_v30 = vld [vmem:[%s2760_s10] sm:$0xff] }
  0x8c   :  { %v72_v31 = vpop.permute.xlu0 %71 }
  0x8d   :  { %vm74_vm3 = vcmp.eq.s32.totalorder %v2385_v25, %v72_v31  ;;  %v1069_v31 = vld [vmem:[%s2760_s10 + $0x8] sm:$0xff] }
  0x8e   :  { %v1723_v35 = vsel %vm74_vm3, 1.0, %v2243_v29  ;;  %v2180_v40 = vpack.c.bf16 %v1069_v31, %v1068_v30  ;;  %vm642_vm3 = vcmp.eq.s32.totalorder %v2481_v4, 11  ;;  %v2177_v4 = vpack.c.bf16 %v1075_v3, %v1074_v2  ;;  %v1225_v30 = vld [vmem:[%s2760_s10 + $0x58] sm:$0xff] }
  0x8f   :  { %1900 = vmatmul.mubr.msk.f32.vlgmr.msra.gmra.mrb[0].mxu0 %vm79_vm1, %v1723_v35 }
  0x90   :  { %2148 = vmatpush3.bf16.msra.mxu0 %v2147_v32  ;;  %1949 = vmatprep.mubr.msk.f32.mxu0 %vm2244_vm4, %v2243_v29  ;;  %v510_v44 = vpop.permute.xlu0 %509 }
  0x91   :  { %2149 = vmatprep.subr.bf16.mxu0 %v2242_v17  ;;  %vm513_vm7 = vcmp.eq.s32.totalorder %v2385_v25, %v510_v44 }
  0x92   :  { %v1744_v46 = vsel %vm513_vm7, 1.0, %v2243_v29  ;;  %vm971_vm7 = vcmask 261124  }
  0x94   :  { %2151 = vmatpush3.bf16.msra.mxu0 %v2150_v36 }
  0x95   :  { %2152 = vmatprep.subr.bf16.mxu0 %v2242_v17 }
  0x98   :  { %2154 = vmatpush3.bf16.msra.mxu0 %v2153_v39  ;;  %v2159_v39 = vpack.c.bf16 %v1752_v28, %v1751_v26  ;;  %v1224_v28 = vld [vmem:[%s2760_s10 + $0x50] sm:$0xff] }
  0x99   :  { %1947 = vmatprep.subr.mxu0 %v2243_v29 }
  0x9c   :  { %1948 = vmatpush3.msk.msra.mxu0 %vm86_vm0, %v500_v41  ;;  %vm987_vm0 = vcmp.eq.s32.totalorder %v2385_v25, %v986_v22  ;;  %v1759_v25 = vld [vmem:[%s2758_s8 + $0x40] sm:$0xff] }
  0x9d   :  { %1950 = vmatmul.mubr.msk.f32.vlgmr.msra.gmra.mrb[2].mxu0 %vm79_vm1, %v1742_v42  ;;  %2161 = vmatprep.subr.bf16.mxu0 %v2242_v17  ;;  %v1767_v43 = vsel %vm987_vm0, 1.0, %v2243_v29  ;;  %v2168_v51 = vpack.c.bf16 %v1760_v50, %v1759_v25  ;;  %v1389_v25 = vld [vmem:[%s2762_s12 + $0x18] sm:$0xff] }
  0x9e   :  { %1952 = vmatprep.mubr.msk.f32.mxu0 %vm2244_vm4, %v2243_v29  ;;  %2163 = vmatpush3.bf16.msra.mxu0 %v2448_v52 }
  0x9f   :  { %2164 = vmatprep.subr.bf16.mxu0 %v2242_v17 }
  0xa1   :  { %1953 = vmatmul.mubr.msk.f32.gmra.mrb[4].mxu0 %vm79_vm1, %v1743_v45 }
  0xa2   :  { %1955 = vmatprep.mubr.msk.f32.mxu0 %vm2244_vm4, %v2243_v29  ;;  %2166 = vmatpush3.bf16.msra.mxu0 %v2458_v55 }
  0xa3   :  { %2009 = vmatprep.subr.mxu0 %v2243_v29 }
  0xa5   :  { %1956 = vmatmul.mubr.msk.f32.gmra.mrb[6].mxu0 %vm79_vm1, %v1744_v46  ;;  %vm990_vm1 = vcmask 31744  }
  0xa6   :  { %1983 = vmatprep.mubr.msk.f32.mxu0 %vm2244_vm4, %v2243_v29 }
 0x162   :  { %v1901_v59 = vpop.f32.mrb[0].mxu0 }
 0x163   :  { %v169_v60 = vrot.slane %v1901_v59, 7  ;;  %v176_v61 = vrot.slane %v1901_v59, 1  ;;  %v156_v62 = vpop.f32.mrb[1].mxu0 }
 0x164   :  { %v168_v0 = vrot.slane %v156_v62, 7  ;;  %v175_v1 = vrot.slane %v156_v62, 1  ;;  %1910 = vmatprep.mubr.msk.f32.mxu1 %vm217_vm8, %v156_v62 }
 0x165   :  { %1911 = vmatmul.mubr.msk.f32.vlgmr.msra.gmra.mrb[0].mxu1 %vm217_vm8, %v1901_v59  ;;  %v180_v19 = vsel %vm174_vm9, %v176_v61, 0.0  ;;  %v2174_v59 = vpack.c.bf16 %v1073_v57, %v1072_v56  ;;  %v1392_v56 = vld [vmem:[%s2762_s12 + $0x30] sm:$0xff]  ;;  %v1393_v57 = vld [vmem:[%s2762_s12 + $0x38] sm:$0xff] }
 0x166   :  { %2133 = vmatpush3.bf16.msra.mxu1 %v2130_v49  ;;  %v173_v5 = vsel %vm167_vm10, 0.0, %v168_v0  ;;  %v170_v6 = vsel %vm167_vm10, %v168_v0, %v169_v60  ;;  %v177_v7 = vsel %vm174_vm9, %v175_v1, %v176_v61  ;;  %v207_v34 = vsel %vm193_vm14, 0.0, %v180_v19  ;;  %v1071_v0 = vld [vmem:[%s2760_s10 + $0x18] sm:$0xff]  ;;  %v1302_v19 = vld [vmem:[%s2760_s10 + $0x70] sm:$0xff] }
 0x167   :  { %2135 = vmatprep.subr.bf16.mxu1 %v2134_v63  ;;  %v200_v8 = vsel %vm184_vm11, 0.0, %v173_v5  ;;  %v201_v13 = vsel %vm187_vm12, 0.0, %v170_v6  ;;  %v206_v14 = vsel %vm190_vm13, 0.0, %v177_v7  ;;  %v633_v60 = vadd.s32 16, %v2469_v58  ;;  %v1070_v58 = vld [vmem:[%s2760_s10 + $0x10] sm:$0xff]  ;;  %v1300_v6 = vld [vmem:[%s2760_s10 + $0x60] sm:$0xff] }
 0x168   :  { %1921 = vmatprep.mubr.msk.f32.mxu1 %vm217_vm8, %v200_v8  ;;  %v2183_v1 = vpack.c.bf16 %v1071_v0, %v1070_v58  ;;  %v1741_v5 = vld [vmem:[%s2761_s7] ss:$0 sm:$0xff]  ;;  %v1301_v7 = vld [vmem:[%s2760_s10 + $0x68] sm:$0xff]  ;;  %v2201_v58 = vpack.c.bf16 %v1393_v57, %v1392_v56 }
 0x169   :  { %vm646_vm5 = vcmp.eq.s32.totalorder %v633_v60, 23  ;;  %v2192_v16 = vpack.c.bf16 %v1301_v7, %v1300_v6 }
 0x16a   :  { %2137 = vmatpush3.bf16.msra.mxu1 %v2134_v63 }
 0x16b   :  { %2139 = vmatprep.subr.bf16.mxu1 %v2138_v9 }
 0x16d   :  { %1922 = vmatmul.mubr.msk.f32.vlgmr.msra.gmra.mrb[0].mxu1 %vm217_vm8, %v201_v13  ;;  %v1222_v13 = vld [vmem:[%s2760_s10 + $0x40] sm:$0xff] }
 0x16e   :  { %2141 = vmatpush3.bf16.msra.mxu1 %v2138_v9  ;;  %1932 = vmatprep.mubr.msk.f32.mxu1 %vm217_vm8, %v206_v14  ;;  %v1223_v14 = vld [vmem:[%s2760_s10 + $0x48] sm:$0xff] }
 0x16f   :  { %2143 = vmatprep.subr.bf16.mxu1 %v2142_v12 }
 0x170   :  { %v598_v18 = vpop.f32.mrb[2].mxu0 }
 0x171   :  { %v615_v20 = vrot.slane %v598_v18, 7  ;;  %v1951_v21 = vpop.f32.mrb[3].mxu0  ;;  %v624_v35 = vrot.slane %v598_v18, 1 }
 0x172   :  { %2145 = vmatpush3.bf16.msra.mxu1 %v2142_v12 }
 0x173   :  { %v623_v27 = vsel %vm167_vm10, 0.0, %v615_v20  ;;  %2155 = vmatprep.subr.bf16.mxu1 %v2242_v17 }
 0x174   :  { %v656_v32 = vsel %vm184_vm11, 0.0, %v623_v27  ;;  %v603_v33 = vpop.f32.mrb[4].mxu0 }
 0x175   :  { %v616_v36 = vrot.slane %v603_v33, 7  ;;  %v625_v37 = vrot.slane %v603_v33, 1  ;;  %v1954_v38 = vpop.f32.mrb[5].mxu0  ;;  %1984 = vmatmul.mubr.msk.f32.vlgmr.msra.gmra.mrb[8].mxu0 %vm217_vm8, %v656_v32  ;;  %1933 = vmatmul.mubr.msk.f32.vlgmr.msra.gmra.mrb[0].mxu1 %vm217_vm8, %v207_v34 }
 0x176   :  { %2010 = vmatpush3.msk.msra.mxu0 %vm994_vm15, %v983_v23  ;;  %2157 = vmatpush3.bf16.msra.mxu1 %v2156_v24  ;;  %v2186_v23 = vpack.c.bf16 %v1223_v14, %v1222_v13 }
 0x177   :  { %v617_v41 = vsel %vm167_vm10, %v615_v20, %v616_v36  ;;  %v626_v42 = vsel %vm174_vm9, %v624_v35, %v625_v37  ;;  %2011 = vmatprep.mubr.msk.f32.mxu0 %vm2244_vm4, %v2243_v29  ;;  %2158 = vmatprep.subr.bf16.mxu1 %v2242_v17  ;;  %v1303_v20 = vld [vmem:[%s2760_s10 + $0x78] sm:$0xff]  ;;  %v1386_v35 = vld [vmem:[%s2762_s12] sm:$0xff] }
 0x178   :  { %v608_v44 = vpop.f32.mrb[6].mxu0  ;;  %1966 = vmatprep.mubr.msk.f32.mxu1 %vm2244_vm4, %v2243_v29  ;;  %2179 = vmatprep.subr.bf16.mxu0 %v2242_v17  ;;  %v657_v54 = vsel %vm636_vm2, 0.0, %v617_v41 }
 0x179   :  { %v618_v45 = vrot.slane %v608_v44, 7  ;;  %v627_v46 = vrot.slane %v608_v44, 1  ;;  %v1957_v47 = vpop.f32.mrb[7].mxu0  ;;  %2012 = vmatmul.mubr.msk.f32.vlgmr.msra.gmra.mrb[10].mxu0 %vm990_vm1, %v1767_v43  ;;  %v1390_v43 = vld [vmem:[%s2762_s12 + $0x20] sm:$0xff] }
 0x17a   :  { %2160 = vmatpush3.bf16.msra.mxu1 %v2159_v39  ;;  %2181 = vmatpush3.bf16.msra.mxu0 %v2180_v40  ;;  %v2189_v39 = vpack.c.bf16 %v1225_v30, %v1224_v28 }
 0x17b   :  { %2227 = vmatprep.subr.bf16.mxu1 %v2242_v17  ;;  %v619_v48 = vsel %vm167_vm10, %v616_v36, %v618_v45  ;;  %v628_v49 = vsel %vm174_vm9, %v625_v37, %v627_v46  ;;  %2182 = vmatprep.subr.bf16.mxu0 %v2242_v17  ;;  %v632_v62 = vsel %vm174_vm9, %v627_v46, 0.0  ;;  %v1387_v36 = vld [vmem:[%s2762_s12 + $0x8] sm:$0xff] }
 0x17c   :  { %2033 = vmatprep.mubr.msk.f32.mxu0 %vm2244_vm4, %v2243_v29  ;;  %v666_v61 = vsel %vm642_vm3, 0.0, %v628_v49  ;;  %v667_v63 = vsel %vm646_vm5, 0.0, %v632_v62  ;;  %v2204_v46 = vpack.c.bf16 %v1387_v36, %v1386_v35  ;;  %v1388_v49 = vld [vmem:[%s2762_s12 + $0x10] sm:$0xff] }
 0x17d   :  { %1967 = vmatmul.mubr.msk.f32.vlgmr.msra.gmra.mrb[2].mxu1 %vm217_vm8, %v598_v18  ;;  %v2207_v60 = vpack.c.bf16 %v1389_v25, %v1388_v49  ;;  %v1542_v25 = vld [vmem:[%s2762_s12 + $0x50] sm:$0xff] }
 0x17e   :  { %1969 = vmatprep.mubr.msk.f32.mxu1 %vm2244_vm4, %v2243_v29  ;;  %2229 = vmatpush3.bf16.msra.mxu1 %v2448_v52  ;;  %v1761_v52 = vld [vmem:[%s2758_s8 + $0x50] sm:$0xff] }
 0x17f   :  { %2228 = vmatprep.subr.bf16.mxu1 %v2242_v17  ;;  %2184 = vmatpush3.bf16.msra.mxu0 %v2183_v1 }
 0x180   :  { %2191 = vmatprep.subr.bf16.mxu0 %v2242_v17 }
 0x181   :  { %1970 = vmatmul.mubr.msk.f32.gmra.mrb[4].mxu1 %vm217_vm8, %v603_v33  ;;  %v2195_v33 = vpack.c.bf16 %v1303_v20, %v1302_v19 }
 0x182   :  { %1972 = vmatprep.mubr.msk.f32.mxu1 %vm2244_vm4, %v2243_v29  ;;  %2230 = vmatpush3.bf16.msra.mxu1 %v2458_v55  ;;  %v2171_v55 = vpack.c.bf16 %v1762_v53, %v1761_v52 }
 0x183   :  { %2167 = vmatprep.subr.bf16.mxu1 %v2242_v17 }
 0x185   :  { %1973 = vmatmul.mubr.msk.f32.gmra.mrb[6].mxu1 %vm217_vm8, %v608_v44  ;;  %v1391_v44 = vld [vmem:[%s2762_s12 + $0x28] sm:$0xff] }
 0x186   :  { %1986 = vmatprep.mubr.msk.f32.mxu1 %vm2244_vm4, %v2243_v29  ;;  %v2198_v52 = vpack.c.bf16 %v1391_v44, %v1390_v43 }
 0x189   :  { %1987 = vmatmul.mubr.msk.f32.vlgmr.msra.gmra.mrb[8].mxu1 %vm217_vm8, %v657_v54 }
 0x18a   :  { %2169 = vmatpush3.bf16.msra.mxu1 %v2168_v51  ;;  %1989 = vmatprep.mubr.msk.f32.mxu1 %vm2244_vm4, %v2243_v29 }
 0x18b   :  { %2170 = vmatprep.subr.bf16.mxu1 %v2242_v17 }
 0x18d   :  { %1990 = vmatmul.mubr.msk.f32.gmra.mrb[10].mxu1 %vm217_vm8, %v619_v48 }
 0x18e   :  { %2172 = vmatpush3.bf16.msra.mxu1 %v2171_v55  ;;  %2000 = vmatprep.mubr.msk.f32.mxu1 %vm2244_vm4, %v2243_v29 }
 0x18f   :  { %2173 = vmatprep.subr.bf16.mxu1 %v2242_v17 }
 0x191   :  { %2001 = vmatmul.mubr.msk.f32.vlgmr.msra.gmra.mrb[12].mxu1 %vm217_vm8, %v626_v42 }
 0x192   :  { %2003 = vmatprep.mubr.msk.f32.mxu1 %vm2244_vm4, %v2243_v29  ;;  %2175 = vmatpush3.bf16.msra.mxu1 %v2174_v59 }
 0x193   :  { %2176 = vmatprep.subr.bf16.mxu1 %v2242_v17 }
 0x195   :  { %2004 = vmatmul.mubr.msk.f32.gmra.mrb[14].mxu1 %vm217_vm8, %v666_v61 }
 0x196   :  { %2006 = vmatprep.mubr.msk.f32.mxu1 %vm2244_vm4, %v2243_v29  ;;  %2178 = vmatpush3.bf16.msra.mxu1 %v2177_v4 }
 0x197   :  { %2185 = vmatprep.subr.bf16.mxu1 %v2242_v17 }
 0x199   :  { %2007 = vmatmul.mubr.msk.f32.gmra.mrb[16].mxu1 %vm217_vm8, %v667_v63 }
 0x19a   :  { %2022 = vmatprep.mubr.msk.f32.mxu1 %vm2244_vm4, %v2243_v29 }
 0x248   :  { %v838_v8 = vpop.f32.mrb[8].mxu0  ;;  %v1934_v9 = vpop.f32.mrb[0].mxu1 }
 0x249   :  { %v473_v10 = vadd.f32 %v1934_v9, %v1741_v5  ;;  %v1985_v11 = vpop.f32.mrb[9].mxu0  ;;  %v455_v12 = vpop.f32.mrb[1].mxu1  ;;  %v1766_v9 = vld [vmem:[%s2763_s9] ss:$0 sm:$0xff] }
 0x24a   :  { %v472_v15 = vadd.f32 %v1741_v5, %v455_v12 }
 0x24b   :  { %v475_v18 = vmax.f32 %v473_v10, 0.0 }
 0x24c   :  { %v474_v21 = vmax.f32 %v472_v15, 0.0  ;;  %v1064_v22 = vpop.f32.mrb[10].mxu0 }
 0x24d   :  { %v483_v24 = vsel %vm217_vm8, %v475_v18, -inf  ;;  %v1077_v26 = vrot.slane %v1064_v22, 2  ;;  %v2013_v27 = vpop.f32.mrb[11].mxu0  ;;  %2034 = vmatmul.mubr.msk.f32.vlgmr.msra.gmra.mrb[12].mxu0 %vm217_vm8, %v1064_v22  ;;  %v1304_v48 = vrot.slane %v1064_v22, 6  ;;  %v1226_v54 = vrot.slane %v1064_v22, 4 }
 0x24e   :  { %v484_v31 = vrot.slane %v483_v24, 4  ;;  %v476_v32 = vsel %vm217_vm8, %v474_v21, -inf  ;;  %2193 = vmatpush3.bf16.msra.mxu0 %v2192_v16  ;;  %2055 = vmatprep.mubr.msk.f32.mxu0 %vm2244_vm4, %v2243_v29 }
 0x24f   :  { %v477_v34 = vrot.slane %v476_v32, 4  ;;  %2023 = vmatmul.mubr.msk.f32.vlgmr.msra.gmra.mrb[18].mxu1 %vm217_vm8, %v1077_v26  ;;  %2194 = vmatprep.subr.bf16.mxu0 %v2242_v17 }
 0x250   :  { %v485_v37 = vmax.f32 %v483_v24, %v484_v31  ;;  %2187 = vmatpush3.bf16.msra.mxu1 %v2186_v23  ;;  %v749_v38 = vpop.f32.mrb[2].mxu1  ;;  %2044 = vmatprep.mubr.msk.f32.mxu1 %vm2244_vm4, %v2243_v29 }
 0x251   :  { %v478_v40 = vmax.f32 %v476_v32, %v477_v34  ;;  %v839_v41 = vadd.f32 %v838_v8, %v749_v38  ;;  %v1968_v42 = vpop.f32.mrb[3].mxu1  ;;  %2188 = vmatprep.subr.bf16.mxu1 %v2242_v17 }
 0x252   :  { %v486_v45 = vrot.slane %v485_v37, 2  ;;  %2196 = vmatpush3.bf16.msra.mxu0 %v2195_v33 }
 0x253   :  { %v479_v47 = vrot.slane %v478_v40, 2  ;;  %2203 = vmatprep.subr.bf16.mxu0 %v2242_v17 }
 0x254   :  { %v487_v50 = vmax.f32 %v485_v37, %v486_v45  ;;  %2190 = vmatpush3.bf16.msra.mxu1 %v2189_v39  ;;  %v754_v51 = vpop.f32.mrb[4].mxu1 }
 0x255   :  { %v480_v53 = vmax.f32 %v478_v40, %v479_v47  ;;  %2056 = vmatmul.mubr.msk.f32.vlgmr.msra.gmra.mrb[14].mxu0 %vm217_vm8, %v1304_v48  ;;  %v1971_v55 = vpop.f32.mrb[5].mxu1  ;;  %2197 = vmatprep.subr.bf16.mxu1 %v2242_v17  ;;  %v1540_v47 = vld [vmem:[%s2762_s12 + $0x40] sm:$0xff]  ;;  %v1541_v48 = vld [vmem:[%s2762_s12 + $0x48] sm:$0xff] }
 0x256   :  { %v488_v59 = vrot.slane %v487_v50, 1  ;;  %2205 = vmatpush3.bf16.msra.mxu0 %v2204_v46  ;;  %2077 = vmatprep.mubr.msk.f32.mxu0 %vm2244_vm4, %v2243_v29  ;;  %v2210_v49 = vpack.c.bf16 %v1541_v48, %v1540_v47  ;;  %v1630_v55 = vld [vmem:[%s2764_s14 + $0x18] sm:$0xff] }
 0x257   :  { %v481_v61 = vrot.slane %v480_v53, 1  ;;  %2045 = vmatmul.mubr.msk.f32.vlgmr.msra.gmra.mrb[20].mxu1 %vm217_vm8, %v1226_v54  ;;  %2206 = vmatprep.subr.bf16.mxu0 %v2242_v17 }
 0x258   :  { %v489_v62 = vmax.f32 %v487_v50, %v488_v59  ;;  %v759_v63 = vpop.f32.mrb[6].mxu1  ;;  %2199 = vmatpush3.bf16.msra.mxu1 %v2198_v52  ;;  %2066 = vmatprep.mubr.msk.f32.mxu1 %vm2244_vm4, %v2243_v29  ;;  %v1628_v52 = vld [vmem:[%s2764_s14 + $0x8] sm:$0xff] }
 0x259   :  { %v482_v0 = vmax.f32 %v480_v53, %v481_v61  ;;  %v1974_v1 = vpop.f32.mrb[7].mxu1  ;;  %2200 = vmatprep.subr.bf16.mxu1 %v2242_v17  ;;  %v1629_v53 = vld [vmem:[%s2764_s14 + $0x10] sm:$0xff] }
 0x25a   :  { %2208 = vmatpush3.bf16.msra.mxu0 %v2207_v60  ;;  %v2219_v56 = vpack.c.bf16 %v1630_v55, %v1629_v53 }
 0x25b   :  { %v490_v2 = vsel %vm167_vm10, %v482_v0, %v489_v62  ;;  %2215 = vmatprep.subr.bf16.mxu0 %v2242_v17 }
 0x25c   :  { %v843_v3 = vpop.f32.mrb[8].mxu1  ;;  %2202 = vmatpush3.bf16.msra.mxu1 %v2201_v58 }
 0x25d   :  { %v844_v4 = vadd.f32 %v843_v3, %v754_v51  ;;  %v1988_v5 = vpop.f32.mrb[9].mxu1  ;;  %2078 = vmatmul.mubr.msk.f32.vlgmr.msra.gmra.mrb[16].mxu0 %vm217_vm8, %v490_v2  ;;  %2209 = vmatprep.subr.bf16.mxu1 %v2242_v17  ;;  %v1627_v51 = vld [vmem:[%s2764_s14] sm:$0xff] }
 0x25e   :  { %2107 = vmatprep.mubr.msk.f32.mxu0 %vm2244_vm4, %v2243_v29  ;;  %v2216_v54 = vpack.c.bf16 %v1628_v52, %v1627_v51  ;;  %v1774_v3 = vld [vmem:[%s2765_s11] ss:$0 sm:$0xff] }
 0x260   :  { %v848_v6 = vpop.f32.mrb[10].mxu1  ;;  %2217 = vmatpush3.bf16.msra.mxu0 %v2216_v54 }
 0x261   :  { %v849_v7 = vadd.f32 %v848_v6, %v759_v63  ;;  %v1991_v8 = vpop.f32.mrb[11].mxu1  ;;  %2218 = vmatprep.subr.bf16.mxu0 %v2242_v17 }
 0x264   :  { %v932_v10 = vpop.f32.mrb[12].mxu1  ;;  %2220 = vmatpush3.bf16.msra.mxu0 %v2219_v56 }
 0x265   :  { %v946_v11 = vadd.f32 %v932_v10, %v839_v41  ;;  %v2002_v12 = vpop.f32.mrb[13].mxu1  ;;  %2221 = vmatprep.subr.bf16.mxu0 %v2242_v17 }
 0x266   :  { %v1632_v12 = vld [vmem:[%s2764_s14 + $0x28] sm:$0xff] }
 0x267   :  { %v955_v13 = vadd.f32 %v1766_v9, %v946_v11  ;;  %v1631_v11 = vld [vmem:[%s2764_s14 + $0x20] sm:$0xff] }
 0x268   :  { %v937_v14 = vpop.f32.mrb[14].mxu1 }
 0x269   :  { %v947_v15 = vadd.f32 %v937_v14, %v844_v4  ;;  %v2005_v16 = vpop.f32.mrb[15].mxu1  ;;  %v958_v18 = vmax.f32 %v955_v13, 0.0  ;;  %v2222_v13 = vpack.c.bf16 %v1632_v12, %v1631_v11  ;;  %v1633_v14 = vld [vmem:[%s2764_s14 + $0x30] sm:$0xff] }
 0x26b   :  { %v956_v19 = vadd.f32 %v1766_v9, %v947_v15  ;;  %v961_v24 = vsel %vm217_vm8, %v958_v18, -inf  ;;  %2223 = vmatpush3.bf16.msra.mxu0 %v2222_v13  ;;  %v1634_v15 = vld [vmem:[%s2764_s14 + $0x38] sm:$0xff]  ;;  %v21_v18 = vstv %s2766_s15 }
 0x26c   :  { %v942_v20 = vpop.f32.mrb[16].mxu1  ;;  %2224 = vmatprep.subr.bf16.mxu0 %v2242_v17  ;;  %v2225_v16 = vpack.c.bf16 %v1634_v15, %v1633_v14  ;;  %22 = vst [vmem:[#allocation2] sm:$0x1] %v21_v18 }
 0x26d   :  { %v959_v21 = vmax.f32 %v956_v19, 0.0  ;;  %v948_v22 = vadd.f32 %v942_v20, %v849_v7  ;;  %v2008_v23 = vpop.f32.mrb[17].mxu1 }
 0x26f   :  { %v963_v26 = vsel %vm962_vm6, %v959_v21, -inf  ;;  %v957_v27 = vadd.f32 %v1766_v9, %v948_v22  ;;  %v972_v32 = vsel %vm971_vm7, %v959_v21, -inf  ;;  %2226 = vmatpush3.bf16.msra.mxu0 %v2225_v16 }
 0x270   :  { %v964_v28 = vmax.f32 %v961_v24, %v963_v26 }
 0x271   :  { %v960_v30 = vmax.f32 %v957_v27, 0.0 }
 0x272   :  { %v965_v31 = vrot.slane %v964_v28, 4 }
 0x273   :  { %v973_v33 = vsel %vm217_vm8, %v960_v30, -inf  ;;  %v1779_v24 = vld [vmem:[#allocation2] ss:$0 sm:$0xff] }
 0x274   :  { %v966_v34 = vmax.f32 %v964_v28, %v965_v31  ;;  %v974_v35 = vmax.f32 %v972_v32, %v973_v33 }
 0x276   :  { %v967_v36 = vrot.slane %v966_v34, 2  ;;  %v975_v37 = vrot.slane %v974_v35, 4 }
 0x278   :  { %v968_v38 = vmax.f32 %v966_v34, %v967_v36  ;;  %v976_v39 = vmax.f32 %v974_v35, %v975_v37 }
 0x27a   :  { %v977_v40 = vrot.slane %v976_v39, 2  ;;  %v969_v41 = vrot.slane %v968_v38, 1 }
 0x27c   :  { %v978_v42 = vmax.f32 %v976_v39, %v977_v40  ;;  %v970_v44 = vmax.f32 %v968_v38, %v969_v41 }
 0x27e   :  { %v979_v43 = vrot.slane %v978_v42, 1 }
 0x280   :  { %v980_v45 = vmax.f32 %v978_v42, %v979_v43 }
 0x282   :  { %v981_v46 = vsel %vm167_vm10, %v970_v44, %v980_v45 }
 0x283   :  { %2067 = vmatmul.mubr.msk.f32.vlgmr.msra.gmra.mrb[22].mxu1 %vm217_vm8, %v981_v46 }
 0x284   :  { %2088 = vmatprep.mubr.msk.f32.mxu1 %vm2244_vm4, %v2243_v29  ;;  %2211 = vmatpush3.bf16.msra.mxu1 %v2210_v49  ;;  %v1543_v29 = vld [vmem:[%s2762_s12 + $0x58] sm:$0xff]  ;;  %vm1642_vm4 = vcmask 523264  }
 0x285   :  { %2212 = vmatprep.subr.bf16.mxu1 %v2242_v17  ;;  %v2213_v50 = vpack.c.bf16 %v1543_v29, %v1542_v25  ;;  %v1778_v17 = vld [vmem:[%s2767_s13] ss:$0 sm:$0xff] }
 0x288   :  { %2214 = vmatpush3.bf16.msra.mxu1 %v2213_v50 }
 0x320   :  { %v1218_v57 = vpop.f32.mrb[12].mxu0 }
 0x321   :  { %v2035_v59 = vpop.f32.mrb[13].mxu0 }
 0x322   :  { %v1146_v60 = vpop.f32.mrb[18].mxu1 }
 0x323   :  { %v1219_v61 = vadd.f32 %v1218_v57, %v1146_v60  ;;  %v2024_v62 = vpop.f32.mrb[19].mxu1 }
 0x328   :  { %v1373_v63 = vpop.f32.mrb[14].mxu0 }
 0x329   :  { %v2057_v58 = vpop.f32.mrb[15].mxu0 }
 0x32a   :  { %v1295_v0 = vpop.f32.mrb[20].mxu1 }
 0x32b   :  { %v1299_v1 = vadd.f32 %v1295_v0, %v1219_v61  ;;  %v2046_v2 = vpop.f32.mrb[21].mxu1 }
 0x32d   :  { %v1377_v4 = vadd.f32 %v1373_v63, %v1299_v1 }
 0x32f   :  { %v1385_v5 = vadd.f32 %v1774_v3, %v1377_v4 }
 0x330   :  { %v1536_v6 = vpop.f32.mrb[16].mxu0 }
 0x331   :  { %2089 = vmatmul.mubr.msk.f32.vlgmr.msra.gmra.mrb[24].mxu1 %vm217_vm8, %v1385_v5  ;;  %v2079_v7 = vpop.f32.mrb[17].mxu0  ;;  %vm1716_vm8 = vcmask 1024  }
 0x356   :  { %v1463_v8 = vpop.f32.mrb[22].mxu1 }
 0x357   :  { %v1537_v9 = vadd.f32 %v1536_v6, %v1463_v8  ;;  %v2068_v10 = vpop.f32.mrb[23].mxu1 }
 0x404   :  { %v1613_v19 = vpop.f32.mrb[24].mxu1 }
 0x405   :  { %v1617_v20 = vadd.f32 %v1613_v19, %v1537_v9  ;;  %v2090_v21 = vpop.f32.mrb[25].mxu1 }
 0x407   :  { %v1625_v22 = vadd.f32 %v1778_v17, %v1617_v20 }
 0x409   :  { %v1626_v23 = vmax.f32 %v1625_v22, 0.0 }
 0x40b   :  { %2108 = vmatmul.mubr.msk.f32.vlgmr.msra.gmra.mrb[18].mxu0 %vm1642_vm4, %v1626_v23 }
 0x4de   :  { %v1712_v26 = vpop.f32.mrb[18].mxu0 }
 0x4df   :  { %v1713_v27 = vadd.f32 %v1779_v24, %v1712_v26  ;;  %v2109_v28 = vpop.f32.mrb[19].mxu0 }
 0x4e1   :  { %1717 = vst.msk [vmem:[%s2768_s16] sm:$0x3] %vm1716_vm8, %v1713_v27 }

</bundles_post_ra>
